<compile_context>
chip_gen: v6e
topology: v6e:2x2x1
jax: 0.10.0
libtpu: 0.0.40
codegen_flags: <defaults>
</compile_context>

<pallas_src>
import jax
import jax.numpy as jnp
from jax.experimental import pallas as pl
from jax.experimental.pallas import tpu as pltpu

HIDDEN = 256            # fixed by the module definition (nn.Linear(input, 256))
LANE = 128              # TPU lane width
SUBLANE_ALIGN = 16      # row-tile alignment (covers f32 (8,) and bf16 (16,) sublane tiling)


def _round_up(x, m):
    return ((x + m - 1) // m) * m


def mlp_kernel(x_ref, w1_ref, b1_ref, w2_ref, b2_ref, o_ref):
    # First linear + ReLU: MXU matmul with f32 accumulation, f32 VPU epilogue.
    h = jnp.dot(x_ref[...], w1_ref[...], preferred_element_type=jnp.float32)
    h = jnp.maximum(h + b1_ref[...], 0.0)          # b1 is (1, HIDDEN): broadcasts over rows
    # Second linear + ReLU: feed the MXU in the weights' dtype (bf16 when
    # matmul_dtype=bf16 was requested); accumulation stays f32.
    y = jnp.dot(h.astype(w2_ref.dtype), w2_ref[...],
                preferred_element_type=jnp.float32)
    y = jnp.maximum(y + b2_ref[...], 0.0)          # b2 is (1, D_out_padded)
    o_ref[...] = y.astype(o_ref.dtype)


def perception_forward(x, w1, b1, w2, b2, *, batch_tile=512, matmul_dtype=None):
    """Fused forward pass: relu(relu(x @ w1 + b1) @ w2 + b2).

    batch_tile:   upper bound on rows per grid step (rounded to a multiple of 16).
    matmul_dtype: optional dtype (e.g. jnp.bfloat16) for the MXU inputs; the
                  accumulation, epilogue and output dtype stay unchanged.
    """
    out_dtype = x.dtype
    B, D_in = x.shape
    D_in_w, D_hid = w1.shape
    D_hid_w, D_out = w2.shape
    assert D_in_w == D_in and D_hid_w == D_hid and D_hid == HIDDEN

    # --- batch tile: bounded, sublane-aligned; grid iterates over the batch ---
    bt = max(SUBLANE_ALIGN, min(batch_tile, _round_up(B, SUBLANE_ALIGN)))
    bt = _round_up(bt, SUBLANE_ALIGN)
    B_pad = _round_up(B, bt)
    if B_pad != B:                        # ragged batch: pad rows, slice result
        x = jnp.pad(x, ((0, B_pad - B), (0, 0)))

    # --- lane-dense output: pad feature dim to a multiple of 128 (weight-side pad) ---
    D_out_p = _round_up(D_out, LANE)
    if D_out_p != D_out:
        w2 = jnp.pad(w2, ((0, 0), (0, D_out_p - D_out)))
        b2 = jnp.pad(b2, ((0, 0), (0, D_out_p - D_out)))

    # --- optional bf16 (or other) MXU feeding; biases stay f32 for the epilogue ---
    if matmul_dtype is not None:
        x = x.astype(matmul_dtype)
        w1 = w1.astype(matmul_dtype)
        w2 = w2.astype(matmul_dtype)
    b1 = b1.astype(jnp.float32)
    b2 = b2.astype(jnp.float32)

    grid = (B_pad // bt,)

    itemsize = jnp.dtype(x.dtype).itemsize
    cost = pl.CostEstimate(
        flops=2 * B_pad * (D_in * D_hid + D_hid * D_out_p),
        transcendentals=0,
        bytes_accessed=(B_pad * D_in * itemsize          # x
                        + D_in * D_hid * itemsize        # w1
                        + D_hid * 4                      # b1 (f32)
                        + D_hid * D_out_p * itemsize     # w2
                        + D_out_p * 4                    # b2 (f32)
                        + B_pad * D_out_p * jnp.dtype(out_dtype).itemsize),  # out
    )

    out = pl.pallas_call(
        mlp_kernel,
        out_shape=jax.ShapeDtypeStruct((B_pad, D_out_p), out_dtype),
        grid_spec=pltpu.PrefetchScalarGridSpec(
            num_scalar_prefetch=0,
            grid=grid,
            in_specs=[
                pl.BlockSpec((bt, D_in), lambda i: (i, 0)),       # x tile (pipelined)
                pl.BlockSpec((D_in, D_hid), lambda i: (0, 0)),    # w1 (grid-resident)
                pl.BlockSpec((1, D_hid), lambda i: (0, 0)),       # b1
                pl.BlockSpec((D_hid, D_out_p), lambda i: (0, 0)), # w2 (grid-resident)
                pl.BlockSpec((1, D_out_p), lambda i: (0, 0)),     # b2
            ],
            out_specs=pl.BlockSpec((bt, D_out_p), lambda i: (i, 0)),
        ),
        compiler_params=pltpu.CompilerParams(
            # Batch axis is independent -> shardable across v7x's 2 TensorCores.
            dimension_semantics=("parallel",),
        ),
        cost_estimate=cost,
    )(x, w1, b1, w2, b2)

    # Slice off batch / feature padding.
    return out[:B, :D_out]


def init_params(key, input_size, feature_size, dtype=jnp.float32):
    """Deterministic PyTorch-Linear-style init (uniform(-1/sqrt(fan_in), 1/sqrt(fan_in)))."""
    k1, k2, k3, k4 = jax.random.split(key, 4)
    bound1 = 1.0 / (input_size ** 0.5)
    w1 = jax.random.uniform(k1, (input_size, HIDDEN), dtype, -bound1, bound1)
    b1 = jax.random.uniform(k2, (1, HIDDEN), dtype, -bound1, bound1)
    bound2 = 1.0 / (HIDDEN ** 0.5)
    w2 = jax.random.uniform(k3, (HIDDEN, feature_size), dtype, -bound2, bound2)
    b2 = jax.random.uniform(k4, (1, feature_size), dtype, -bound2, bound2)
    return w1, b1, w2, b2


if __name__ == "__main__":
    # Small shapes consistent with the module's forward: x is [batch, input_size].
    # batch=200 is deliberately NOT a multiple of the tile (exercises ragged padding)
    # and feature_size=64 is NOT a multiple of 128 (exercises lane-dense out padding).
    batch, input_size, feature_size = 200, 32, 64

    key = jax.random.PRNGKey(0)
    kx, kp = jax.random.split(key)
    x = jax.random.normal(kx, (batch, input_size), jnp.float32)
    w1, b1, w2, b2 = init_params(kp, input_size, feature_size)

    # Pure-JAX reference of the same math.
    ref = jnp.maximum(jnp.maximum(x @ w1 + b1, 0.0) @ w2 + b2, 0.0)

    # f32 path; batch_tile=64 -> 4 pipelined grid steps over the (padded) batch.
    out = jax.block_until_ready(
        perception_forward(x, w1, b1, w2, b2, batch_tile=64))
    assert out.shape == (batch, feature_size)
    assert jnp.allclose(out, ref, atol=1e-5, rtol=1e-5)

    # bf16 MXU-feeding path (the v6e/v7x recommendation); f32 accumulation, so
    # only a modest tolerance relaxation is needed.
    out_bf16 = jax.block_until_ready(
        perception_forward(x, w1, b1, w2, b2, batch_tile=64,
                           matmul_dtype=jnp.bfloat16))
    assert out_bf16.shape == (batch, feature_size)
    assert jnp.allclose(out_bf16, ref, atol=1e-1, rtol=5e-2)

    print("KERNEL_OK")
</pallas_src>

<mosaic_0001>
module attributes {stable_mosaic.version = 11 : i64} {
  func.func @mlp_kernel(%arg0: i32, %arg1: memref<64x32xf32, #tpu.memory_space<vmem>>, %arg2: memref<32x256xf32, #tpu.memory_space<vmem>>, %arg3: memref<1x256xf32, #tpu.memory_space<vmem>>, %arg4: memref<256x128xf32, #tpu.memory_space<vmem>>, %arg5: memref<1x128xf32, #tpu.memory_space<vmem>>, %arg6: memref<64x128xf32, #tpu.memory_space<vmem>>) attributes {dimension_semantics = [#tpu.dimension_semantics<parallel>], iteration_bounds = array<i64: 4>, scalar_prefetch = 0 : i64, scratch_operands = 0 : i64, tpu.core_type = #tpu.core_type<tc>, window_params = [{transform_indices = @transform_0, window_bounds = array<i64: 64, 32>}, {pipeline_mode = #tpu.pipeline_mode<synchronous>, transform_indices = @transform_1, window_bounds = array<i64: 32, 256>}, {pipeline_mode = #tpu.pipeline_mode<synchronous>, transform_indices = @transform_2, window_bounds = array<i64: 1, 256>}, {pipeline_mode = #tpu.pipeline_mode<synchronous>, transform_indices = @transform_3, window_bounds = array<i64: 256, 128>}, {pipeline_mode = #tpu.pipeline_mode<synchronous>, transform_indices = @transform_4, window_bounds = array<i64: 1, 128>}, {transform_indices = @transform_5, window_bounds = array<i64: 64, 128>}]} {
    %c0 = arith.constant 0 : index
    %c0_0 = arith.constant 0 : index
    %0 = vector.load %arg1[%c0, %c0_0] : memref<64x32xf32, #tpu.memory_space<vmem>>, vector<64x32xf32>
    %c0_1 = arith.constant 0 : index
    %c0_2 = arith.constant 0 : index
    %1 = vector.load %arg2[%c0_1, %c0_2] : memref<32x256xf32, #tpu.memory_space<vmem>>, vector<32x256xf32>
    %cst = arith.constant dense<0.000000e+00> : vector<64x256xf32>
    %2 = tpu.matmul %0, %1, %cst {dimension_numbers = #tpu.dot_dimension_numbers<[1], [0], [0], [1], [0, 0, 1, 1], [], []>} : vector<64x32xf32>, vector<32x256xf32>, vector<64x256xf32> -> vector<64x256xf32>
    %c0_3 = arith.constant 0 : index
    %c0_4 = arith.constant 0 : index
    %3 = vector.load %arg3[%c0_3, %c0_4] : memref<1x256xf32, #tpu.memory_space<vmem>>, vector<1x256xf32>
    %4 = vector.broadcast %3 : vector<1x256xf32> to vector<64x256xf32>
    %5 = arith.addf %2, %4 : vector<64x256xf32>
    %cst_5 = arith.constant 0.000000e+00 : f32
    %6 = vector.broadcast %cst_5 : f32 to vector<64x256xf32>
    %7 = arith.maximumf %5, %6 : vector<64x256xf32>
    %c0_6 = arith.constant 0 : index
    %c0_7 = arith.constant 0 : index
    %8 = vector.load %arg4[%c0_6, %c0_7] : memref<256x128xf32, #tpu.memory_space<vmem>>, vector<256x128xf32>
    %cst_8 = arith.constant dense<0.000000e+00> : vector<64x128xf32>
    %9 = tpu.matmul %7, %8, %cst_8 {dimension_numbers = #tpu.dot_dimension_numbers<[1], [0], [0], [1], [0, 0, 1, 1], [], []>} : vector<64x256xf32>, vector<256x128xf32>, vector<64x128xf32> -> vector<64x128xf32>
    %c0_9 = arith.constant 0 : index
    %c0_10 = arith.constant 0 : index
    %10 = vector.load %arg5[%c0_9, %c0_10] : memref<1x128xf32, #tpu.memory_space<vmem>>, vector<1x128xf32>
    %11 = vector.broadcast %10 : vector<1x128xf32> to vector<64x128xf32>
    %12 = arith.addf %9, %11 : vector<64x128xf32>
    %cst_11 = arith.constant 0.000000e+00 : f32
    %13 = vector.broadcast %cst_11 : f32 to vector<64x128xf32>
    %14 = arith.maximumf %12, %13 : vector<64x128xf32>
    %c0_12 = arith.constant 0 : index
    %c0_13 = arith.constant 0 : index
    %15 = vector.load %arg6[%c0_12, %c0_13] : memref<64x128xf32, #tpu.memory_space<vmem>>, vector<64x128xf32>
    tpu.vector_store %arg6[%c0_12, %c0_13], %14 {strides = array<i32>} : memref<64x128xf32, #tpu.memory_space<vmem>>, vector<64x128xf32>,
    return
  }
  func.func @transform_0(%arg0: i32) -> (i32, i32) {
    %c0_i32 = arith.constant 0 : i32
    %c0_i32_0 = arith.constant 0 : i32
    return %arg0, %c0_i32 : i32, i32
  }
  func.func @transform_1(%arg0: i32) -> (i32, i32) {
    %c0_i32 = arith.constant 0 : i32
    %c0_i32_0 = arith.constant 0 : i32
    %c0_i32_1 = arith.constant 0 : i32
    return %c0_i32, %c0_i32_0 : i32, i32
  }
  func.func @transform_2(%arg0: i32) -> (i32, i32) {
    %c0_i32 = arith.constant 0 : i32
    %c0_i32_0 = arith.constant 0 : i32
    %c0_i32_1 = arith.constant 0 : i32
    return %c0_i32, %c0_i32_0 : i32, i32
  }
  func.func @transform_3(%arg0: i32) -> (i32, i32) {
    %c0_i32 = arith.constant 0 : i32
    %c0_i32_0 = arith.constant 0 : i32
    %c0_i32_1 = arith.constant 0 : i32
    return %c0_i32, %c0_i32_0 : i32, i32
  }
  func.func @transform_4(%arg0: i32) -> (i32, i32) {
    %c0_i32 = arith.constant 0 : i32
    %c0_i32_0 = arith.constant 0 : i32
    %c0_i32_1 = arith.constant 0 : i32
    return %c0_i32, %c0_i32_0 : i32, i32
  }
  func.func @transform_5(%arg0: i32) -> (i32, i32) {
    %c0_i32 = arith.constant 0 : i32
    %c0_i32_0 = arith.constant 0 : i32
    return %arg0, %c0_i32 : i32, i32
  }
}

</mosaic_0001>

<bundles_post_ra>
// kernel: tpu_custom_call.1
= control target key start
LH: loop header
LB: loop body
LE: loop exit
PB: predicated region body
PF: predicated region fallthrough
CT: control target
= control target key end

     0   :  { %10 = vsyncpa [#allocation3], 0  ;;  %s1160_s0 = inlined_call_operand.vmem [shape: f32[256,32], index: 0, kind: input, shape index: {}]   ;;  %s1161_s1 = inlined_call_operand.vmem [shape: f32[32,256], index: 1, kind: input, shape index: {}]   ;;  %s1162_s2 = inlined_call_operand.vmem [shape: f32[1,256], index: 2, kind: input, shape index: {}]   ;;  %s1163_s3 = inlined_call_operand.vmem [shape: f32[256,128], index: 3, kind: input, shape index: {}]   ;;  %s1164_s4 = inlined_call_operand.vmem [shape: f32[1,128], index: 4, kind: input, shape index: {}]   ;;  %s1165_s5 = inlined_call_operand.hbm [shape: f32[256,128], index: 5, kind: output, shape index: {}]  }
   0x1   :  { %12 = vsyncpa [#allocation3 + $0x1], 0  ;;  %s892_s18 = smov 0   ;;  %s894_s19 = smov 0  }
   0x2   :  { %s896_s20 = smov 0   ;;  %s898_s21 = smov 0  }
   0x3 LB: > { %s913_s22 = sadd.s32 4294967295, %s856_s21   ;;  %s644_s23 = sadd.s32 4294967294, %s856_s21   ;;  %s856_s21 = sphi %s898_s21, %s1171_s21   ;;  %s852_s20 = sphi %s896_s20, %s1170_s20   ;;  %s848_s19 = sphi %s894_s19, %s1169_s19   ;;  %s844_s18 = sphi %s892_s18, %s1168_s18  }
   0x4   : > { %s917_s24 = sadd.s32 1, %s856_s21   ;;  %s135_s25 = sadd.s32 1, %s852_s20 }
   0x5   : > { %s132_s26 = ssub.s32 %s856_s21, %s917_s24  ;;  %p145_p0 = scmp.ne.s32.totalorder %s852_s20, %s848_s19 }
   0x6   : > { %p133_p1 = scmp.eq.s32.totalorder %s132_s26, 0  ;;  %p146_p2 = scmp.eq.s32.totalorder %s913_s22, 3 }
   0x7   : > { %p151_p3 = scmp.ne.s32.totalorder %s848_s19, %s844_s18  ;;  %p152_p4 = scmp.eq.s32.totalorder %s644_s23, 3 }
   0x8   : > { %s928_s27 = scalar_select %p133_p1, %s852_s20, %s135_s25  }
   0x9   : > { %p930_p5 = por %p146_p2, %p145_p0  ;;  %p934_p6 = por %p152_p4, %p151_p3 }
   0xa   : > { %p647_p7 = scmp.ge.s32.totalorder %s856_s21, 1  ;;  %p191_p8 = scmp.lt.s32.totalorder %s856_s21, 5 }
   0xc   : > { %p192_p9 = pnand %p647_p7, %p191_p8 }
   0xd   : > { %s649_s11 = sshll.u32 (!%p192_p9), %s913_s22, 3  ;;  %s216_s15 = sand.u32 (!%p192_p9), 1, %s848_s19  }
   0xe   : > { %195 = sbr.rel (%p192_p9) target bundleno = 471 (0x1d7), region = 40  ;;  %p220_p10 = scmp.lt.s32.totalorder (!%p192_p9), %s649_s11, 31 }
   0xf   : > { %s665_s26 = sshll.u32 (!%p192_p9), %s913_s22, 10  ;;  %s1120_s8 = scalar_lea.sflag (!%p192_p9), [#allocation3], %s216_s15 }
  0x10   : > { %s1113_s7 = scalar_lea.hbm (!%p192_p9), %s1165_s5, %s665_s26  ;;  %s859_s22 = smov (!%p192_p9), [#allocation2]  }
  0x11   : > { %s800_s10 = sshll.u32 (!%p192_p9), %s859_s22, 4  ;;  %s801_s10 = int_to_ptr.vmem [resolvable:$false] %s800_s10 }
  0x12   : > { %s802_s12 = scalar_lea.vmem (!%p192_p9), %s801_s10, 2048 }
  0x13   : > { %v241_v0 = vld [vmem:[%s1161_s1 + $0x38] sm:$0xff]  ;;  %v240_v1 = vld [vmem:[%s1161_s1 + $0x30] sm:$0xff]  ;;  %v239_v2 = vld [vmem:[%s1161_s1 + $0x28] sm:$0xff]  ;;  %v858_v4 = vmov 0.0   ;;  %s1173_s11 = smov (!%p220_p10, %s649_s11), 31  ;;  %vm254_vm0 = vcmask 261120   ;;  %v244_v49 = vlaneseq }
  0x14   : > { %303 = vmatprep.subr.mxu0 %v241_v0  ;;  %v238_v3 = vld [vmem:[%s1161_s1 + $0x20] sm:$0xff]  ;;  %343 = vmatprep.mubr.f32.mxu0 %v858_v4  ;;  %v237_v5 = vld [vmem:[%s1161_s1 + $0x18] sm:$0xff]  ;;  %v236_v7 = vld [vmem:[%s1161_s1 + $0x10] sm:$0xff]  ;;  %s650_s13 = sshll.u32 %s1173_s11, 3 }
  0x15   : > { %304 = vmatpush1.msra.mxu0 %v240_v1  ;;  %v439_v6 = vld [vmem:[%s1163_s3 + $0xf8] sm:$0xff]  ;;  %v235_v9 = vld [vmem:[%s1161_s1 + $0x8] sm:$0xff]  ;;  %v438_v10 = vld [vmem:[%s1163_s3 + $0xf0] sm:$0xff]  ;;  %s981_s23 = scalar_lea.vmem %s1160_s0, %s650_s13  ;;  %v245_v50 = vshrl.u32 %v244_v49, 7 }
  0x16   : > { %305 = vmatprep.subr.mxu0 %v239_v2  ;;  %v423_v8 = vld [vmem:[%s1163_s3 + $0x78] sm:$0xff]  ;;  %722 = vmatprep.subr.mxu1 %v439_v6  ;;  %v234_v11 = vld [vmem:[%s1161_s1] sm:$0xff]  ;;  %v422_v12 = vld [vmem:[%s1163_s3 + $0x70] sm:$0xff] }
  0x17   : > { %306 = vmatpush1.msra.mxu0 %v238_v3  ;;  %738 = vmatpush3.msra.mxu1 %v423_v8  ;;  %v437_v13 = vld [vmem:[%s1163_s3 + $0xe8] sm:$0xff]  ;;  %v226_v14 = vld [vmem:[%s981_s23] sm:$0xff]  ;;  %v228_v19 = vld [vmem:[%s981_s23 + $0x10] sm:$0xff]  ;;  %v246_v51 = vsub.s32 0, %v245_v50  ;;  %v250_v53 = vsub.s32 1, %v245_v50 }
  0x18   : > { %307 = vmatprep.subr.mxu0 %v237_v5  ;;  %723 = vmatprep.subr.mxu1 %v438_v10  ;;  %v421_v15 = vld [vmem:[%s1163_s3 + $0x68] sm:$0xff]  ;;  %v436_v17 = vld [vmem:[%s1163_s3 + $0xe0] sm:$0xff]  ;;  %v435_v20 = vld [vmem:[%s1163_s3 + $0xd8] sm:$0xff] }
  0x19   : > { %308 = vmatpush1.msra.mxu0 %v236_v7  ;;  %739 = vmatpush3.msra.mxu1 %v422_v12  ;;  %v227_v16 = vld [vmem:[%s981_s23 + $0x8] sm:$0xff]  ;;  %v420_v18 = vld [vmem:[%s1163_s3 + $0x60] sm:$0xff]  ;;  %v419_v21 = vld [vmem:[%s1163_s3 + $0x58] sm:$0xff] }
  0x1a   : > { %309 = vmatprep.subr.mxu0 %v235_v9  ;;  %724 = vmatprep.subr.mxu1 %v437_v13  ;;  %v434_v22 = vld [vmem:[%s1163_s3 + $0xd0] sm:$0xff]  ;;  %v229_v24 = vld [vmem:[%s981_s23 + $0x18] sm:$0xff]  ;;  %v433_v25 = vld [vmem:[%s1163_s3 + $0xc8] sm:$0xff] }
  0x1b   : > { %310 = vmatpush1.msra.mxu0 %v234_v11  ;;  %740 = vmatpush3.msra.mxu1 %v421_v15  ;;  %v418_v23 = vld [vmem:[%s1163_s3 + $0x50] sm:$0xff]  ;;  %v417_v26 = vld [vmem:[%s1163_s3 + $0x48] sm:$0xff]  ;;  %v432_v27 = vld [vmem:[%s1163_s3 + $0xc0] sm:$0xff] }
  0x1c   : > { %651 = vmatmul.mubr.msk.f32.vlgmr.msra.gmra.mxu0 %vm254_vm0, %v226_v14  ;;  %666 = vmatprep.subr.mxu0 %v439_v6  ;;  %v416_v28 = vld [vmem:[%s1163_s3 + $0x40] sm:$0xff]  ;;  %v431_v30 = vld [vmem:[%s1163_s3 + $0xb8] sm:$0xff]  ;;  %v430_v32 = vld [vmem:[%s1163_s3 + $0xb0] sm:$0xff] }
  0x1d   : > { %349 = vmatprep.mubr.f32.mxu0 %v858_v4  ;;  %667 = vmatpush3.msra.mxu0 %v423_v8  ;;  %v230_v29 = vld [vmem:[%s981_s23 + $0x20] sm:$0xff]  ;;  %v415_v31 = vld [vmem:[%s1163_s3 + $0x38] sm:$0xff]  ;;  %v414_v33 = vld [vmem:[%s1163_s3 + $0x30] sm:$0xff] }
  0x1e   : > { %668 = vmatprep.subr.mxu0 %v438_v10  ;;  %725 = vmatprep.subr.mxu1 %v436_v17  ;;  %v231_v34 = vld [vmem:[%s981_s23 + $0x28] sm:$0xff]  ;;  %v428_v37 = vld [vmem:[%s1163_s3 + $0xa0] sm:$0xff]  ;;  %v232_v39 = vld [vmem:[%s981_s23 + $0x30] sm:$0xff] }
  0x1f   : > { %669 = vmatpush3.msra.mxu0 %v422_v12  ;;  %741 = vmatpush3.msra.mxu1 %v420_v18  ;;  %v429_v35 = vld [vmem:[%s1163_s3 + $0xa8] sm:$0xff]  ;;  %v412_v38 = vld [vmem:[%s1163_s3 + $0x20] sm:$0xff]  ;;  %v233_v40 = vld [vmem:[%s981_s23 + $0x38] sm:$0xff]  ;;  %s648_s23 = sshll.u32 %s216_s15, 6 }
  0x20   : > { %652 = vmatmul.mubr.msk.f32.gmra.mxu0 %vm254_vm0, %v227_v16  ;;  %670 = vmatprep.subr.mxu0 %v437_v13  ;;  %v413_v36 = vld [vmem:[%s1163_s3 + $0x28] sm:$0xff]  ;;  %v427_v41 = vld [vmem:[%s1163_s3 + $0x98] sm:$0xff]  ;;  %v426_v43 = vld [vmem:[%s1163_s3 + $0x90] sm:$0xff]  ;;  %s1099_s25 = scalar_lea.vmem [#allocation2], %s648_s23 }
  0x21   : > { %355 = vmatprep.mubr.f32.mxu0 %v858_v4  ;;  %671 = vmatpush3.msra.mxu0 %v421_v15  ;;  %v411_v42 = vld [vmem:[%s1163_s3 + $0x18] sm:$0xff]  ;;  %v410_v44 = vld [vmem:[%s1163_s3 + $0x10] sm:$0xff]  ;;  %v425_v45 = vld [vmem:[%s1163_s3 + $0x88] sm:$0xff]  ;;  %s582_s11 = sshll.u32 %s1099_s25, 4  ;;  %s1115_s11 = int_to_ptr.vmem [resolvable:$true] %s582_s11 }
  0x22   : > { %672 = vmatprep.subr.mxu0 %v436_v17  ;;  %726 = vmatprep.subr.mxu1 %v435_v20  ;;  %v409_v46 = vld [vmem:[%s1163_s3 + $0x8] sm:$0xff]  ;;  %v424_v47 = vld [vmem:[%s1163_s3 + $0x80] sm:$0xff]  ;;  %s796_s9 = scalar_lea.vmem %s1115_s11, 1024  ;;  %p803_p0 = scmp.lt.s32.totalorder %s1115_s11, %s801_s10 }
  0x23   : > { %673 = vmatpush3.msra.mxu0 %v420_v18  ;;  %742 = vmatpush3.msra.mxu1 %v419_v21  ;;  %v408_v48 = vld [vmem:[%s1163_s3] sm:$0xff]  ;;  %p797_p11 = scmp.ne.s32.totalorder %s1115_s11, %s796_s9  ;;  %p804_p1 = scmp.lt.s32.totalorder %s802_s12, %s796_s9 }
  0x24   : > { %653 = vmatmul.mubr.msk.f32.gmra.mxu0 %vm254_vm0, %v228_v19  ;;  %674 = vmatprep.subr.mxu0 %v435_v20  ;;  %v242_v52 = vld [vmem:[%s1162_s2] sm:$0x3] }
  0x25   : > { %361 = vmatprep.mubr.f32.mxu0 %v858_v4  ;;  %675 = vmatpush3.msra.mxu0 %v419_v21  ;;  %v247_v54 = vrot.slane %v242_v52, %v246_v51  ;;  %v251_v55 = vrot.slane %v242_v52, %v250_v53  ;;  %p798_p12 = pnand %p797_p11, %p930_p5  ;;  %p805_p2 = por %p804_p1, %p803_p0 }
  0x26   : > { %676 = vmatprep.subr.mxu0 %v434_v22  ;;  %727 = vmatprep.subr.mxu1 %v434_v22 }
  0x27   : > { %677 = vmatpush3.msra.mxu0 %v418_v23  ;;  %743 = vmatpush3.msra.mxu1 %v418_v23  ;;  %p799_p13 = pneg %p798_p12 }
  0x28   : > { %654 = vmatmul.mubr.msk.f32.gmra.mxu0 %vm254_vm0, %v229_v24  ;;  %678 = vmatprep.subr.mxu0 %v433_v25 }
  0x29   : > { %367 = vmatprep.mubr.f32.mxu0 %v858_v4  ;;  %679 = vmatpush3.msra.mxu0 %v417_v26  ;;  %p806_p3 = pnand %p805_p2, %p799_p13 }
  0x2a   : > { %680 = vmatprep.subr.mxu0 %v432_v27  ;;  %728 = vmatprep.subr.mxu1 %v433_v25 }
  0x2b   : > { %681 = vmatpush3.msra.mxu0 %v416_v28  ;;  %744 = vmatpush3.msra.mxu1 %v417_v26 }
  0x2c   : > { %655 = vmatmul.mubr.msk.f32.gmra.mxu0 %vm254_vm0, %v230_v29  ;;  %682 = vmatprep.subr.mxu0 %v431_v30 }
  0x2d   : > { %373 = vmatprep.mubr.f32.mxu0 %v858_v4  ;;  %683 = vmatpush3.msra.mxu0 %v415_v31 }
  0x2e   : > { %684 = vmatprep.subr.mxu0 %v430_v32  ;;  %729 = vmatprep.subr.mxu1 %v432_v27 }
  0x2f   : > { %685 = vmatpush3.msra.mxu0 %v414_v33  ;;  %745 = vmatpush3.msra.mxu1 %v416_v28 }
  0x30   : > { %656 = vmatmul.mubr.msk.f32.gmra.mxu0 %vm254_vm0, %v231_v34  ;;  %686 = vmatprep.subr.mxu0 %v429_v35 }
  0x31   : > { %379 = vmatprep.mubr.f32.mxu0 %v858_v4  ;;  %687 = vmatpush3.msra.mxu0 %v413_v36 }
  0x32   : > { %688 = vmatprep.subr.mxu0 %v428_v37  ;;  %730 = vmatprep.subr.mxu1 %v431_v30 }
  0x33   : > { %689 = vmatpush3.msra.mxu0 %v412_v38  ;;  %746 = vmatpush3.msra.mxu1 %v415_v31 }
  0x34   : > { %657 = vmatmul.mubr.msk.f32.gmra.mxu0 %vm254_vm0, %v232_v39  ;;  %731 = vmatprep.subr.mxu1 %v430_v32 }
  0x35   : > { %385 = vmatprep.mubr.f32.mxu0 %v858_v4  ;;  %747 = vmatpush3.msra.mxu1 %v414_v33 }
  0x36   : > { %732 = vmatprep.subr.mxu1 %v429_v35  ;;  %690 = vmatprep.subr.mxu0 %v427_v41 }
  0x37   : > { %748 = vmatpush3.msra.mxu1 %v413_v36  ;;  %691 = vmatpush3.msra.mxu0 %v411_v42 }
  0x38   : > { %658 = vmatmul.mubr.msk.f32.gmra.mxu0 %vm254_vm0, %v233_v40  ;;  %733 = vmatprep.subr.mxu1 %v428_v37 }
  0x39   : > { %749 = vmatpush3.msra.mxu1 %v412_v38  ;;  %692 = vmatprep.subr.mxu0 %v426_v43 }
  0x3a   : > { %734 = vmatprep.subr.mxu1 %v427_v41  ;;  %693 = vmatpush3.msra.mxu0 %v410_v44  ;;  %v659_v41 = vld [vmem:[%s1164_s4] ss:$0 sm:$0xff] }
  0x3b   : > { %750 = vmatpush3.msra.mxu1 %v411_v42  ;;  %694 = vmatprep.subr.mxu0 %v425_v45 }
  0x3c   : > { %735 = vmatprep.subr.mxu1 %v426_v43  ;;  %695 = vmatpush3.msra.mxu0 %v409_v46 }
  0x3d   : > { %751 = vmatpush3.msra.mxu1 %v410_v44  ;;  %696 = vmatprep.subr.mxu0 %v424_v47 }
  0x3e   : > { %736 = vmatprep.subr.mxu1 %v425_v45  ;;  %697 = vmatpush3.msra.mxu0 %v408_v48 }
  0x3f   : > { %752 = vmatpush3.msra.mxu1 %v409_v46 }
  0x40   : > { %737 = vmatprep.subr.mxu1 %v424_v47 }
  0x41   : > { %753 = vmatpush3.msra.mxu1 %v408_v48 }
  0xdc   : > { %v345_v56 = vpop.f32.mrf.mxu0 }
  0xdd   : > { %v346_v57 = vadd.f32 %v345_v56, %v247_v54 }
  0xde   : > { %v347_v58 = vpop.f32.mrf.mxu0 }
  0xdf   : > { %v348_v59 = vadd.f32 %v347_v58, %v251_v55  ;;  %v392_v62 = vmax.f32 %v346_v57, 0.0 }
  0xe0   : > { %v351_v60 = vpop.f32.mrf.mxu0 }
  0xe1   : > { %v393_v61 = vmax.f32 %v348_v59, 0.0  ;;  %v352_v63 = vadd.f32 %v351_v60, %v247_v54 }
  0xe2   : > { %v353_v0 = vpop.f32.mrf.mxu0 }
  0xe3   : > { %v354_v1 = vadd.f32 %v353_v0, %v251_v55  ;;  %511 = vmatprep.mubr.f32.mxu0 %v393_v61  ;;  %v394_v4 = vmax.f32 %v352_v63, 0.0 }
  0xe4   : > { %v357_v2 = vpop.f32.mrf.mxu0  ;;  %512 = vmatmul.mubr.f32.vlgmr.msra.gmra.mxu0 %v392_v62 }
  0xe5   : > { %v395_v3 = vmax.f32 %v354_v1, 0.0  ;;  %v358_v5 = vadd.f32 %v357_v2, %v247_v54 }
  0xe6   : > { %v359_v6 = vpop.f32.mrf.mxu0 }
  0xe7   : > { %v360_v7 = vadd.f32 %v359_v6, %v251_v55  ;;  %516 = vmatprep.mubr.f32.mxu0 %v395_v3  ;;  %v396_v10 = vmax.f32 %v358_v5, 0.0 }
  0xe8   : > { %v363_v8 = vpop.f32.mrf.mxu0  ;;  %517 = vmatmul.mubr.f32.gmra.mxu0 %v394_v4 }
  0xe9   : > { %v397_v9 = vmax.f32 %v360_v7, 0.0  ;;  %v364_v11 = vadd.f32 %v363_v8, %v247_v54 }
  0xea   : > { %v365_v12 = vpop.f32.mrf.mxu0 }
  0xeb   : > { %521 = vmatprep.mubr.f32.mxu0 %v397_v9  ;;  %v366_v13 = vadd.f32 %v365_v12, %v251_v55  ;;  %v398_v16 = vmax.f32 %v364_v11, 0.0 }
  0xec   : > { %v369_v14 = vpop.f32.mrf.mxu0  ;;  %522 = vmatmul.mubr.f32.gmra.mxu0 %v396_v10 }
  0xed   : > { %v399_v15 = vmax.f32 %v366_v13, 0.0  ;;  %v370_v17 = vadd.f32 %v369_v14, %v247_v54 }
  0xee   : > { %v371_v18 = vpop.f32.mrf.mxu0 }
  0xef   : > { %v372_v19 = vadd.f32 %v371_v18, %v251_v55  ;;  %526 = vmatprep.mubr.f32.mxu1 %v399_v15  ;;  %v400_v22 = vmax.f32 %v370_v17, 0.0 }
  0xf0   : > { %v375_v20 = vpop.f32.mrf.mxu0  ;;  %527 = vmatmul.mubr.f32.vlgmr.msra.gmra.mxu1 %v398_v16 }
  0xf1   : > { %v401_v21 = vmax.f32 %v372_v19, 0.0  ;;  %v376_v23 = vadd.f32 %v375_v20, %v247_v54 }
  0xf2   : > { %v377_v24 = vpop.f32.mrf.mxu0 }
  0xf3   : > { %v378_v25 = vadd.f32 %v377_v24, %v251_v55  ;;  %531 = vmatprep.mubr.f32.mxu1 %v401_v21  ;;  %v402_v28 = vmax.f32 %v376_v23, 0.0 }
  0xf4   : > { %v381_v26 = vpop.f32.mrf.mxu0  ;;  %532 = vmatmul.mubr.f32.gmra.mxu1 %v400_v22 }
  0xf5   : > { %v403_v27 = vmax.f32 %v378_v25, 0.0  ;;  %v382_v29 = vadd.f32 %v381_v26, %v247_v54 }
  0xf6   : > { %v383_v30 = vpop.f32.mrf.mxu0 }
  0xf7   : > { %v384_v31 = vadd.f32 %v383_v30, %v251_v55  ;;  %536 = vmatprep.mubr.f32.mxu1 %v403_v27  ;;  %v404_v34 = vmax.f32 %v382_v29, 0.0 }
  0xf8   : > { %v387_v32 = vpop.f32.mrf.mxu0  ;;  %537 = vmatmul.mubr.f32.gmra.mxu1 %v402_v28 }
  0xf9   : > { %v405_v33 = vmax.f32 %v384_v31, 0.0  ;;  %v388_v35 = vadd.f32 %v387_v32, %v247_v54 }
  0xfa   : > { %v389_v36 = vpop.f32.mrf.mxu0 }
  0xfb   : > { %v390_v37 = vadd.f32 %v389_v36, %v251_v55  ;;  %541 = vmatprep.mubr.f32.mxu1 %v405_v33  ;;  %v406_v39 = vmax.f32 %v388_v35, 0.0 }
  0xfc   : > { %542 = vmatmul.mubr.f32.gmra.mxu1 %v404_v34 }
  0xfd   : > { %v407_v38 = vmax.f32 %v390_v37, 0.0 }
  0xff   : > { %546 = vmatprep.mubr.f32.mxu1 %v407_v38 }
 0x100   : > { %547 = vmatmul.mubr.f32.gmra.mxu1 %v406_v39 }
 0x1a4   : > { %v698_v40 = vpop.f32.mrf.mxu0 }
 0x1a6   : > { %v699_v42 = vpop.f32.mrf.mxu0 }
 0x1a7   : > { %v700_v43 = vadd.f32 %v699_v42, %v698_v40 }
 0x1a8   : > { %v701_v44 = vpop.f32.mrf.mxu0 }
 0x1a9   : > { %v514_v45 = vadd.f32 %v700_v43, %v659_v41 }
 0x1aa   : > { %v702_v46 = vpop.f32.mrf.mxu0 }
 0x1ab   : > { %v552_v47 = vmax.f32 %v514_v45, 0.0  ;;  %v703_v48 = vadd.f32 %v702_v46, %v701_v44 }
 0x1ac   : > { %v704_v49 = vpop.f32.mrf.mxu0 }
 0x1ad   : > { %560 = vst [vmem:[%s1099_s25] sm:$0xff] %v552_v47  ;;  %v519_v50 = vadd.f32 %v703_v48, %v659_v41 }
 0x1ae   : > { %v705_v51 = vpop.f32.mrf.mxu0 }
 0x1af   : > { %v553_v52 = vmax.f32 %v519_v50, 0.0  ;;  %v706_v53 = vadd.f32 %v705_v51, %v704_v49 }
 0x1b0   : > { %v707_v54 = vpop.f32.mrf.mxu1 }
 0x1b1   : > { %561 = vst [vmem:[%s1099_s25 + $0x8] sm:$0xff] %v553_v52  ;;  %v524_v55 = vadd.f32 %v706_v53, %v659_v41 }
 0x1b2   : > { %v708_v56 = vpop.f32.mrf.mxu1 }
 0x1b3   : > { %v554_v57 = vmax.f32 %v524_v55, 0.0  ;;  %v709_v58 = vadd.f32 %v708_v56, %v707_v54 }
 0x1b4   : > { %v710_v59 = vpop.f32.mrf.mxu1 }
 0x1b5   : > { %562 = vst [vmem:[%s1099_s25 + $0x10] sm:$0xff] %v554_v57  ;;  %v529_v60 = vadd.f32 %v709_v58, %v659_v41 }
 0x1b6   : > { %v711_v61 = vpop.f32.mrf.mxu1 }
 0x1b7   : > { %v555_v62 = vmax.f32 %v529_v60, 0.0  ;;  %v712_v63 = vadd.f32 %v711_v61, %v710_v59 }
 0x1b8   : > { %v713_v0 = vpop.f32.mrf.mxu1 }
 0x1b9   : > { %563 = vst [vmem:[%s1099_s25 + $0x18] sm:$0xff] %v555_v62  ;;  %v534_v1 = vadd.f32 %v712_v63, %v659_v41 }
 0x1ba   : > { %v714_v2 = vpop.f32.mrf.mxu1 }
 0x1bb   : > { %v556_v3 = vmax.f32 %v534_v1, 0.0  ;;  %v715_v4 = vadd.f32 %v714_v2, %v713_v0 }
 0x1bc   : > { %v716_v5 = vpop.f32.mrf.mxu1 }
 0x1bd   : > { %564 = vst [vmem:[%s1099_s25 + $0x20] sm:$0xff] %v556_v3  ;;  %v539_v6 = vadd.f32 %v715_v4, %v659_v41 }
 0x1be   : > { %v717_v7 = vpop.f32.mrf.mxu1 }
 0x1bf   : > { %v557_v8 = vmax.f32 %v539_v6, 0.0  ;;  %v718_v9 = vadd.f32 %v717_v7, %v716_v5 }
 0x1c0   : > { %v719_v10 = vpop.f32.mrf.mxu1 }
 0x1c1   : > { %565 = vst [vmem:[%s1099_s25 + $0x28] sm:$0xff] %v557_v8  ;;  %v544_v11 = vadd.f32 %v718_v9, %v659_v41 }
 0x1c2   : > { %v720_v12 = vpop.f32.mrf.mxu1 }
 0x1c3   : > { %v558_v13 = vmax.f32 %v544_v11, 0.0  ;;  %v721_v14 = vadd.f32 %v720_v12, %v719_v10 }
 0x1c5   : > { %566 = vst [vmem:[%s1099_s25 + $0x30] sm:$0xff] %v558_v13  ;;  %v549_v15 = vadd.f32 %v721_v14, %v659_v41 }
 0x1c7   : > { %v559_v16 = vmax.f32 %v549_v15, 0.0 }
 0x1c9   : > { %567 = vst [vmem:[%s1099_s25 + $0x38] sm:$0xff] %v559_v16 }
 0x1ca   : > { %809 = shalt.err (!%p806_p3)
}
 0x1cb   : > { %s810_s13 = scalar_lea.hbm %s1113_s7, 1024  ;;  %s814_s16 = scalar_lea.hbm %s1165_s5, 4096 }
 0x1cc   : > { %p811_p4 = scmp.ne.s32.totalorder %s1113_s7, %s810_s13  ;;  %p815_p9 = scmp.lt.s32.totalorder %s1113_s7, %s1165_s5 }
 0x1cd   : > { %p816_p10 = scmp.lt.s32.totalorder %s814_s16, %s810_s13 }
 0x1ce   : > { %p812_p7 = pnand %p811_p4, %p930_p5 }
 0x1cf   : > { %p817_p11 = por %p816_p10, %p815_p9 }
 0x1d0   : > { %p813_p8 = pneg %p812_p7 }
 0x1d2   : > { %p818_p12 = pnand %p817_p11, %p813_p8 }
 0x1d4   : > { %821 = shalt.err (!%p818_p12)
}
 0x1d5   : > { %s860_s25 = smov 128   ;;  %s861_s26 = smov 8  }
 0x1d6   : > { %754 = dma.vmem_to_hbm [thread:$0]  (%p930_p5), %s1115_s11, 1024, %s1113_s7, %s1120_s8, %s860_s25, %s860_s25, %s861_s26  }
 0x1d7 PF: > { %p760_p13 = scmp.ge.s32.totalorder %s856_s21, 2  ;;  %s597_s30 = sand.u32 1, %s844_s18  }
 0x1d8   : > { %s598_s6 = scalar_lea.sflag [#allocation3], %s597_s30 }
 0x1d9   : > { %p757_p0 = pnand %p760_p13, %p934_p6 }
 0x1db   : > { %p758_p1 = pneg %p757_p0 }
 0x1dd   : > { %839 = dma.done.wait (%p758_p1), %s598_s6, 1024  }
 0x1de   : > { %841 = vsyncadd (%p758_p1), %s598_s6, 4294966272  ;;  %p15_p2 = scmp.ge.s32.totalorder %s917_s24, 6   ;;  %s1168_s18 = smov %s848_s19 }
 0x1df   : > { %s1169_s19 = smov %s852_s20  ;;  %s1170_s20 = smov %s928_s27 }
 0x1e0   : > { %s1171_s21 = smov %s917_s24  ;;  %17 = sbr.rel (!%p15_p2) target bundleno = 3 (0x3), region = 75 }
 0x1e5   :  { %603 = vsyncpa [#allocation3], 1 }
 0x1e6   :  { %605 = vsyncpa [#allocation3 + $0x1], 1 }

</bundles_post_ra>
